<compile_context>
chip_gen: v5e
topology: v5e:2x2
jax: 0.10.0
libtpu: 0.0.40
codegen_flags: <defaults>
</compile_context>

<pallas_src>
import jax
import jax.numpy as jnp
from jax.experimental import pallas as pl
from jax.experimental.pallas import tpu as pltpu


def gcn_kernel(a_ref, x_ref, r_ref, w1_ref, b1_ref, w2_ref, b2_ref, o_ref):
    # a_ref : (G, N, N)   bf16 normalized adjacency for G graphs
    # x_ref : (G, N, Fin) bf16 node features
    # r_ref : (G, 1, N)   f32 row-mean of Â (folds dgl.mean_nodes)
    # w1_ref: (Fin, H), b1_ref: (1, H), w2_ref: (H, C), b2_ref: (1, C)  (f32)
    # o_ref : (1, G, C)   per-graph readout
    G, N, _ = a_ref.shape
    Fin = x_ref.shape[-1]
    H = w1_ref.shape[-1]

    a = a_ref[...]                      # (G, N, N)
    x = x_ref[...]                      # (G, N, Fin)

    # --- GraphConv 1: Â X W1 + b1 (cheaper association picked at trace time) ---
    if Fin <= H:
        # (Â @ X) @ W1 : N²·Fin + (G·N)·Fin·H
        ax = jnp.einsum('gnm,gmf->gnf', a, x,
                        preferred_element_type=jnp.float32)          # (G, N, Fin) f32
        h1 = jnp.dot(ax.reshape(G * N, Fin), w1_ref[...],
                     preferred_element_type=jnp.float32)             # (G*N, H)
    else:
        # Â @ (X @ W1) : (G·N)·Fin·H + N²·H
        xw = jnp.dot(x.reshape(G * N, Fin), w1_ref[...],
                     preferred_element_type=jnp.float32).reshape(G, N, H)
        h1 = jnp.einsum('gnm,gmh->gnh', a, xw,
                        preferred_element_type=jnp.float32).reshape(G * N, H)

    h1 = jnp.maximum(h1 + b1_ref[...], 0.0).reshape(G, N, H)         # ReLU

    # --- GraphConv 2 + mean_nodes, folded:  mean_n(Â h1 W2 + b2) = (r̄ h1) W2 + b2 ---
    pooled = jnp.einsum('gqn,gnh->gqh', r_ref[...], h1,
                        preferred_element_type=jnp.float32)[:, 0, :]  # (G, H)
    out = jnp.dot(pooled, w2_ref[...],
                  preferred_element_type=jnp.float32) + b2_ref[...]   # (G, C)

    o_ref[0] = jnp.maximum(out, 0.0)                                  # final ReLU


def _pick_graphs_per_block(B, max_g=8):
    """Largest divisor of B that is <= max_g, preferring >=2 grid steps."""
    candidates = [g for g in range(1, min(B, max_g) + 1) if B % g == 0]
    with_two_steps = [g for g in candidates if B // g >= 2]
    return max(with_two_steps) if with_two_steps else max(candidates)


def gcn_forward(adj_norm, x, w1, b1, w2, b2, *, graphs_per_block=None,
                compute_dtype=jnp.bfloat16):
    """adj_norm: (B, N, N) f32, x: (B, N, Fin) f32 -> (B, C) f32."""
    B, N, Fin = x.shape
    H = w1.shape[1]
    C = w2.shape[1]

    G = graphs_per_block or _pick_graphs_per_block(B)
    assert B % G == 0, (B, G)
    nblk = B // G

    # bf16 inputs for HBM bandwidth / MXU rate; accumulation stays f32.
    a_c = adj_norm.astype(compute_dtype)
    x_c = x.astype(compute_dtype)
    # Row-mean of Â per graph: r̄[m] = mean_n Â[n, m]  (f32, computed once).
    rbar = jnp.mean(a_c.astype(jnp.float32), axis=1)[:, None, :]      # (B, 1, N)

    out = pl.pallas_call(
        gcn_kernel,
        out_shape=jax.ShapeDtypeStruct((nblk, G, C), jnp.float32),
        grid_spec=pltpu.PrefetchScalarGridSpec(
            num_scalar_prefetch=0,
            grid=(nblk,),
            in_specs=[
                pl.BlockSpec((G, N, N), lambda i: (i, 0, 0)),     # Â
                pl.BlockSpec((G, N, Fin), lambda i: (i, 0, 0)),   # X
                pl.BlockSpec((G, 1, N), lambda i: (i, 0, 0)),     # r̄
                pl.BlockSpec((Fin, H), lambda i: (0, 0)),         # W1 (shared)
                pl.BlockSpec((1, H), lambda i: (0, 0)),           # b1
                pl.BlockSpec((H, C), lambda i: (0, 0)),           # W2 (shared)
                pl.BlockSpec((1, C), lambda i: (0, 0)),           # b2
            ],
            out_specs=pl.BlockSpec((1, G, C), lambda i: (i, 0, 0)),
        ),
        compiler_params=pltpu.CompilerParams(
            dimension_semantics=("parallel",)),
    )(a_c, x_c, rbar, w1, b1, w2, b2)
    return out.reshape(B, C)


def normalize_adj(adj):
    """Symmetric normalization Â = D^{-1/2} A D^{-1/2} (DGL norm='both')."""
    deg = jnp.sum(adj, axis=-1)                       # (B, N)
    dinv = jnp.where(deg > 0, 1.0 / jnp.sqrt(deg), 0.0)
    return adj * dinv[:, :, None] * dinv[:, None, :]


def reference_forward(adj_norm, x, w1, b1, w2, b2):
    h1 = jnp.maximum(jnp.einsum('bnm,bmf->bnf', adj_norm, x @ w1) + b1, 0.0)
    h2 = jnp.einsum('bnm,bmf->bnf', adj_norm, h1 @ w2) + b2
    return jnp.maximum(jnp.mean(h2, axis=1), 0.0)


if __name__ == "__main__":
    # Small, deterministic problem: batch of 8 graphs, 16 nodes each
    # (B=8 so the batched kernel runs 2 grid steps of 4 graphs each).
    B, N = 8, 16
    in_feats, h_feats, num_classes = 8, 32, 4

    key = jax.random.PRNGKey(0)
    k_adj, k_x, k_w1, k_b1, k_w2, k_b2 = jax.random.split(key, 6)

    # Random symmetric adjacency, no self edges, no zero-degree nodes.
    raw = jax.random.uniform(k_adj, (B, N, N))
    adj = (raw + jnp.swapaxes(raw, -1, -2) > 1.0).astype(jnp.float32)
    adj = adj * (1.0 - jnp.eye(N, dtype=jnp.float32))
    ring = jnp.roll(jnp.eye(N, dtype=jnp.float32), 1, axis=1)
    adj = jnp.clip(adj + ring + ring.T, 0.0, 1.0)
    adj_norm = normalize_adj(adj)

    x = jax.random.normal(k_x, (B, N, in_feats), dtype=jnp.float32)

    w1 = jax.random.normal(k_w1, (in_feats, h_feats), dtype=jnp.float32) * 0.3
    b1 = jax.random.normal(k_b1, (1, h_feats), dtype=jnp.float32) * 0.1
    w2 = jax.random.normal(k_w2, (h_feats, num_classes), dtype=jnp.float32) * 0.3
    b2 = jax.random.normal(k_b2, (1, num_classes), dtype=jnp.float32) * 0.1

    out = gcn_forward(adj_norm, x, w1, b1, w2, b2)
    out = jax.block_until_ready(out)

    # Strict check: f32 reference evaluated on the same bf16-cast inputs, so
    # only accumulation-order / association differences remain (~1e-6 rel).
    a32 = adj_norm.astype(jnp.bfloat16).astype(jnp.float32)
    x32 = x.astype(jnp.bfloat16).astype(jnp.float32)
    ref = reference_forward(a32, x32, w1, b1, w2, b2)

    assert out.shape == (B, num_classes)
    assert jnp.allclose(out, ref, atol=1e-3, rtol=1e-3), (out, ref)

    print("KERNEL_OK")
</pallas_src>

<mosaic_0001>
module attributes {stable_mosaic.version = 11 : i64} {
  func.func @gcn_kernel(%arg0: i32, %arg1: memref<4x16x16xbf16, #tpu.memory_space<vmem>>, %arg2: memref<4x16x8xbf16, #tpu.memory_space<vmem>>, %arg3: memref<4x1x16xf32, #tpu.memory_space<vmem>>, %arg4: memref<8x32xf32, #tpu.memory_space<vmem>>, %arg5: memref<1x32xf32, #tpu.memory_space<vmem>>, %arg6: memref<32x4xf32, #tpu.memory_space<vmem>>, %arg7: memref<1x4xf32, #tpu.memory_space<vmem>>, %arg8: memref<1x4x4xf32, #tpu.memory_space<vmem>>) attributes {dimension_semantics = [#tpu.dimension_semantics<parallel>], iteration_bounds = array<i64: 2>, scalar_prefetch = 0 : i64, scratch_operands = 0 : i64, tpu.core_type = #tpu.core_type<tc>, window_params = [{transform_indices = @transform_0, window_bounds = array<i64: 4, 16, 16>}, {transform_indices = @transform_1, window_bounds = array<i64: 4, 16, 8>}, {transform_indices = @transform_2, window_bounds = array<i64: 4, 1, 16>}, {pipeline_mode = #tpu.pipeline_mode<synchronous>, transform_indices = @transform_3, window_bounds = array<i64: 8, 32>}, {pipeline_mode = #tpu.pipeline_mode<synchronous>, transform_indices = @transform_4, window_bounds = array<i64: 1, 32>}, {pipeline_mode = #tpu.pipeline_mode<synchronous>, transform_indices = @transform_5, window_bounds = array<i64: 32, 4>}, {pipeline_mode = #tpu.pipeline_mode<synchronous>, transform_indices = @transform_6, window_bounds = array<i64: 1, 4>}, {transform_indices = @transform_7, window_bounds = array<i64: 1, 4, 4>}]} {
    %c0 = arith.constant 0 : index
    %c0_0 = arith.constant 0 : index
    %c0_1 = arith.constant 0 : index
    %0 = vector.load %arg1[%c0, %c0_0, %c0_1] : memref<4x16x16xbf16, #tpu.memory_space<vmem>>, vector<4x16x16xbf16>
    %c0_2 = arith.constant 0 : index
    %c0_3 = arith.constant 0 : index
    %c0_4 = arith.constant 0 : index
    %1 = vector.load %arg2[%c0_2, %c0_3, %c0_4] : memref<4x16x8xbf16, #tpu.memory_space<vmem>>, vector<4x16x8xbf16>
    "tpu.trace_start"() <{level = 10 : i32, message = "gnm,gmf->gnf"}> : () -> ()
    %cst = arith.constant dense<0.000000e+00> : vector<4x16x8xf32>
    %2 = tpu.matmul %0, %1, %cst {dimension_numbers = #tpu.dot_dimension_numbers<[2], [1], [1], [2], [0, 0, 0, 1, 1, 2], [0], [0]>} : vector<4x16x16xbf16>, vector<4x16x8xbf16>, vector<4x16x8xf32> -> vector<4x16x8xf32>
    "tpu.trace_stop"() : () -> ()
    %3 = vector.shape_cast %2 : vector<4x16x8xf32> to vector<64x8xf32>
    %c0_5 = arith.constant 0 : index
    %c0_6 = arith.constant 0 : index
    %4 = vector.load %arg4[%c0_5, %c0_6] : memref<8x32xf32, #tpu.memory_space<vmem>>, vector<8x32xf32>
    %cst_7 = arith.constant dense<0.000000e+00> : vector<64x32xf32>
    %5 = tpu.matmul %3, %4, %cst_7 {dimension_numbers = #tpu.dot_dimension_numbers<[1], [0], [0], [1], [0, 0, 1, 1], [], []>} : vector<64x8xf32>, vector<8x32xf32>, vector<64x32xf32> -> vector<64x32xf32>
    %c0_8 = arith.constant 0 : index
    %c0_9 = arith.constant 0 : index
    %6 = vector.load %arg5[%c0_8, %c0_9] : memref<1x32xf32, #tpu.memory_space<vmem>>, vector<1x32xf32>
    %7 = vector.broadcast %6 : vector<1x32xf32> to vector<64x32xf32>
    %8 = arith.addf %5, %7 : vector<64x32xf32>
    %cst_10 = arith.constant 0.000000e+00 : f32
    %9 = vector.broadcast %cst_10 : f32 to vector<64x32xf32>
    %10 = arith.maximumf %8, %9 : vector<64x32xf32>
    %11 = vector.shape_cast %10 : vector<64x32xf32> to vector<4x16x32xf32>
    %c0_11 = arith.constant 0 : index
    %c0_12 = arith.constant 0 : index
    %c0_13 = arith.constant 0 : index
    %12 = vector.load %arg3[%c0_11, %c0_12, %c0_13] : memref<4x1x16xf32, #tpu.memory_space<vmem>>, vector<4x1x16xf32>
    "tpu.trace_start"() <{level = 10 : i32, message = "gqn,gnh->gqh"}> : () -> ()
    %cst_14 = arith.constant dense<0.000000e+00> : vector<4x1x32xf32>
    %13 = tpu.matmul %12, %11, %cst_14 {dimension_numbers = #tpu.dot_dimension_numbers<[2], [1], [1], [2], [0, 0, 0, 1, 1, 2], [0], [0]>} : vector<4x1x16xf32>, vector<4x16x32xf32>, vector<4x1x32xf32> -> vector<4x1x32xf32>
    "tpu.trace_stop"() : () -> ()
    %14 = vector.shape_cast %13 : vector<4x1x32xf32> to vector<4x32xf32>
    %c0_15 = arith.constant 0 : index
    %c0_16 = arith.constant 0 : index
    %15 = vector.load %arg6[%c0_15, %c0_16] : memref<32x4xf32, #tpu.memory_space<vmem>>, vector<32x4xf32>
    %cst_17 = arith.constant dense<0.000000e+00> : vector<4x4xf32>
    %16 = tpu.matmul %14, %15, %cst_17 {dimension_numbers = #tpu.dot_dimension_numbers<[1], [0], [0], [1], [0, 0, 1, 1], [], []>} : vector<4x32xf32>, vector<32x4xf32>, vector<4x4xf32> -> vector<4x4xf32>
    %c0_18 = arith.constant 0 : index
    %c0_19 = arith.constant 0 : index
    %17 = vector.load %arg7[%c0_18, %c0_19] : memref<1x4xf32, #tpu.memory_space<vmem>>, vector<1x4xf32>
    %18 = vector.broadcast %17 : vector<1x4xf32> to vector<4x4xf32>
    %19 = arith.addf %16, %18 : vector<4x4xf32>
    %cst_20 = arith.constant 0.000000e+00 : f32
    %20 = vector.broadcast %cst_20 : f32 to vector<4x4xf32>
    %21 = arith.maximumf %19, %20 : vector<4x4xf32>
    %c0_21 = arith.constant 0 : index
    %c0_22 = arith.constant 0 : index
    %c0_23 = arith.constant 0 : index
    %22 = vector.load %arg8[%c0_21, %c0_22, %c0_23] : memref<1x4x4xf32, #tpu.memory_space<vmem>>, vector<1x4x4xf32>
    %23 = vector.shape_cast %22 : vector<1x4x4xf32> to vector<4x4xf32>
    %24 = vector.shape_cast %21 : vector<4x4xf32> to vector<1x4x4xf32>
    tpu.vector_store %arg8[%c0_21, %c0_22, %c0_23], %24 {strides = array<i32>} : memref<1x4x4xf32, #tpu.memory_space<vmem>>, vector<1x4x4xf32>,
    return
  }
  func.func @transform_0(%arg0: i32) -> (i32, i32, i32) {
    %c0_i32 = arith.constant 0 : i32
    %c0_i32_0 = arith.constant 0 : i32
    %c0_i32_1 = arith.constant 0 : i32
    return %arg0, %c0_i32, %c0_i32_0 : i32, i32, i32
  }
  func.func @transform_1(%arg0: i32) -> (i32, i32, i32) {
    %c0_i32 = arith.constant 0 : i32
    %c0_i32_0 = arith.constant 0 : i32
    %c0_i32_1 = arith.constant 0 : i32
    return %arg0, %c0_i32, %c0_i32_0 : i32, i32, i32
  }
  func.func @transform_2(%arg0: i32) -> (i32, i32, i32) {
    %c0_i32 = arith.constant 0 : i32
    %c0_i32_0 = arith.constant 0 : i32
    %c0_i32_1 = arith.constant 0 : i32
    return %arg0, %c0_i32, %c0_i32_0 : i32, i32, i32
  }
  func.func @transform_3(%arg0: i32) -> (i32, i32) {
    %c0_i32 = arith.constant 0 : i32
    %c0_i32_0 = arith.constant 0 : i32
    %c0_i32_1 = arith.constant 0 : i32
    return %c0_i32, %c0_i32_0 : i32, i32
  }
  func.func @transform_4(%arg0: i32) -> (i32, i32) {
    %c0_i32 = arith.constant 0 : i32
    %c0_i32_0 = arith.constant 0 : i32
    %c0_i32_1 = arith.constant 0 : i32
    return %c0_i32, %c0_i32_0 : i32, i32
  }
  func.func @transform_5(%arg0: i32) -> (i32, i32) {
    %c0_i32 = arith.constant 0 : i32
    %c0_i32_0 = arith.constant 0 : i32
    %c0_i32_1 = arith.constant 0 : i32
    return %c0_i32, %c0_i32_0 : i32, i32
  }
  func.func @transform_6(%arg0: i32) -> (i32, i32) {
    %c0_i32 = arith.constant 0 : i32
    %c0_i32_0 = arith.constant 0 : i32
    %c0_i32_1 = arith.constant 0 : i32
    return %c0_i32, %c0_i32_0 : i32, i32
  }
  func.func @transform_7(%arg0: i32) -> (i32, i32, i32) {
    %c0_i32 = arith.constant 0 : i32
    %c0_i32_0 = arith.constant 0 : i32
    %c0_i32_1 = arith.constant 0 : i32
    return %arg0, %c0_i32, %c0_i32_0 : i32, i32, i32
  }
}

</mosaic_0001>

<bundles_post_ra>
// kernel: tpu_custom_call.1
= control target key start
LH: loop header
LB: loop body
LE: loop exit
PB: predicated region body
PF: predicated region fallthrough
CT: control target
= control target key end

     0   :  { %12 = vsyncpa [#allocation3], 0  ;;  %s1132_s0 = inlined_call_operand.vmem [shape: bf16[8,16,16], index: 0, kind: input, shape index: {}]   ;;  %s1133_s1 = inlined_call_operand.vmem [shape: bf16[8,16,8], index: 1, kind: input, shape index: {}]   ;;  %s1134_s2 = inlined_call_operand.vmem [shape: f32[8,1,16], index: 2, kind: input, shape index: {}]   ;;  %s1135_s3 = inlined_call_operand.vmem [shape: f32[8,32], index: 3, kind: input, shape index: {}]   ;;  %s1136_s4 = inlined_call_operand.vmem [shape: f32[1,32], index: 4, kind: input, shape index: {}]   ;;  %s1137_s5 = inlined_call_operand.vmem [shape: f32[32,4], index: 5, kind: input, shape index: {}]   ;;  %s1138_s6 = inlined_call_operand.vmem [shape: f32[1,4], index: 6, kind: input, shape index: {}]   ;;  %s1139_s7 = inlined_call_operand.hbm [shape: f32[2,4,4], index: 7, kind: output, shape index: {}]  }
   0x1   :  { %14 = vsyncpa [#allocation3 + $0x1], 0  ;;  %s995_s24 = smov 0   ;;  %s997_s25 = smov 0  }
   0x2   :  { %s999_s26 = smov 0   ;;  %s1001_s27 = smov 0  }
   0x3 LB: > { %s773_s28 = sadd.s32 4294967295, %s953_s27   ;;  %s774_s29 = sadd.s32 4294967294, %s953_s27   ;;  %s953_s27 = sphi %s1001_s27, %s1145_s27   ;;  %s949_s26 = sphi %s999_s26, %s1144_s26   ;;  %s945_s25 = sphi %s997_s25, %s1143_s25   ;;  %s941_s24 = sphi %s995_s24, %s1142_s24  }
   0x4   : > { %s1018_s30 = sadd.s32 1, %s953_s27   ;;  %s189_s8 = sadd.s32 1, %s949_s26 }
   0x5   : > { %s186_s9 = ssub.s32 %s953_s27, %s1018_s30  ;;  %p199_p0 = scmp.ne.s32.totalorder %s949_s26, %s945_s25 }
   0x6   : > { %p187_p1 = scmp.eq.s32.totalorder %s186_s9, 0  ;;  %p200_p2 = scmp.eq.s32.totalorder %s773_s28, 1 }
   0x7   : > { %p205_p3 = scmp.ne.s32.totalorder %s945_s25, %s941_s24  ;;  %p206_p4 = scmp.eq.s32.totalorder %s774_s29, 1 }
   0x8   : > { %s1028_s10 = scalar_select %p187_p1, %s949_s26, %s189_s8  }
   0x9   : > { %p1030_p5 = por %p200_p2, %p199_p0  ;;  %p1034_p6 = por %p206_p4, %p205_p3 }
   0xa   : > { %p777_p7 = scmp.ge.s32.totalorder %s953_s27, 1  ;;  %p264_p8 = scmp.lt.s32.totalorder %s953_s27, 3 }
   0xc   : > { %p265_p9 = pnand %p777_p7, %p264_p8 }
   0xd   : > { %s1040_s13 = sshll.u32 (!%p265_p9), %s773_s28, 2  ;;  %s304_s23 = sand.u32 (!%p265_p9), 1, %s945_s25  }
   0xe   : > { %268 = sbr.rel (%p265_p9) target bundleno = 590 (0x24e), region = 48  ;;  %p308_p10 = scmp.lt.s32.totalorder (!%p265_p9), %s1040_s13, 7 }
   0xf   : > { %s778_s28 = sshll.u32 (!%p265_p9), %s304_s23, 2  ;;  %s679_s19 = scalar_lea.sflag (!%p265_p9), [#allocation3], %s304_s23 }
  0x10   : > { %s306_s16 = scalar_lea.vmem (!%p265_p9), [#allocation2], %s778_s28  ;;  %s911_s28 = scalar_lea.hbm (!%p265_p9), %s1139_s7, 8 }
  0x11   : > { %s691_s17 = sshll.u32 (!%p265_p9), %s306_s16, 4  ;;  %s692_s17 = int_to_ptr.vmem [resolvable:$true] %s691_s17 }
  0x13   : > { %s1044_s14 = scalar_select %p308_p10, %s1040_s13, 7  ;;  %vm354_vm0 = vcmask 130048   ;;  %v456_v8 = vld [vmem:[%s1135_s3] sm:$0xff]  ;;  %vm461_vm1 = vcmask 64512   ;;  %v634_v46 = vld [vmem:[%s1137_s5 + $0x18] sm:$0xff]  ;;  %v633_v47 = vld [vmem:[%s1137_s5 + $0x10] sm:$0xff] }
  0x14   : > { %849 = vmatpush.msra.mxu3 %v456_v8  ;;  %v889_v18 = vld [vmem:[%s1136_s4] ss:$0 sm:$0xff]  ;;  %v632_v48 = vld [vmem:[%s1137_s5 + $0x8] sm:$0xff]  ;;  %vm644_vm2 = vcmask 1041409   ;;  %vm647_vm3 = vcmask 1042434   ;;  %vm650_vm4 = vcmask 1043459  }
  0x15   : > { %s839_s15 = sshll.u32 %s1044_s14, 3  ;;  %v631_v49 = vld [vmem:[%s1137_s5] sm:$0xff]  ;;  %vm652_vm5 = vcmask 261120   ;;  %vm676_vm6 = vcmask 27648  }
  0x16   : > { %s312_s18 = scalar_lea.vmem %s1132_s0, %s839_s15  ;;  %s319_s21 = scalar_lea.vmem %s1133_s1, %s839_s15  ;;  %v890_v60 = vld [vmem:[%s1138_s6] ss:$0 sm:$0xff] }
  0x17   : > { %v845_v0 = vld [vmem:[%s319_s21] sm:$0xff]  ;;  %v847_v1 = vld [vmem:[%s319_s21 + $0x10] sm:$0xff]  ;;  %v846_v4 = vld [vmem:[%s319_s21 + $0x8] sm:$0xff]  ;;  %s1075_s15 = scalar_lea.vmem %s1134_s2, %s1044_s14  ;;  %s689_s14 = scalar_lea.hbm %s1139_s7, %s1040_s13 }
  0x18   : > { %v841_v2 = vld [vmem:[%s312_s18] sm:$0xff]  ;;  %v843_v3 = vld [vmem:[%s312_s18 + $0x10] sm:$0xff]  ;;  %365 = vmatpush.bf16.msra.mxu0 %v845_v0  ;;  %421 = vmatpush.bf16.msra.mxu2 %v847_v1  ;;  %v842_v5 = vld [vmem:[%s312_s18 + $0x8] sm:$0xff] }
  0x19   : > { %v848_v6 = vld [vmem:[%s319_s21 + $0x18] sm:$0xff]  ;;  %393 = vmatpush.bf16.msra.mxu1 %v846_v4  ;;  %v535_v25 = vld [vmem:[%s1075_s15] sm:$0x1]  ;;  %v537_v35 = vld [vmem:[%s1075_s15 + $0x2] sm:$0x1] }
  0x1a   : > { %v844_v7 = vld [vmem:[%s312_s18 + $0x18] sm:$0xff]  ;;  %v536_v39 = vld [vmem:[%s1075_s15 + $0x1] sm:$0x1]  ;;  %v538_v45 = vld [vmem:[%s1075_s15 + $0x3] sm:$0x1]  ;;  %s693_s18 = sshll.u32 %s689_s14, 4  ;;  %s694_s18 = int_to_ptr.hbm [resolvable:$true] %s693_s18 }
  0x1b   : > { %794 = vmatmul.msk.bf16.vlgmr.msra.gmra.mxu0 %vm354_vm0, %v841_v2  ;;  %812 = vmatmul.msk.bf16.vlgmr.msra.gmra.mxu2 %vm354_vm0, %v843_v3  ;;  %s905_s20 = sshra.s32 %s694_s18, 4  ;;  %s906_s20 = int_to_ptr.hbm [resolvable:$true] %s905_s20 }
  0x1c   : > { %803 = vmatmul.msk.bf16.vlgmr.msra.gmra.mxu1 %vm354_vm0, %v842_v5  ;;  %501 = vmatpush.msrb.mxu0 %v456_v8  ;;  %s907_s21 = scalar_lea.hbm %s906_s20, 4  ;;  %p912_p0 = scmp.lt.s32.totalorder %s906_s20, %s1139_s7 }
  0x1d   : > { %449 = vmatpush.bf16.msrb.mxu1 %v848_v6  ;;  %p908_p11 = scmp.ne.s32.totalorder %s906_s20, %s907_s21  ;;  %p913_p1 = scmp.lt.s32.totalorder %s911_s28, %s907_s21 }
  0x1f   : > { %p909_p12 = pnand %p908_p11, %p1030_p5  ;;  %p914_p2 = por %p913_p1, %p912_p0 }
  0x21   : > { %p910_p13 = pneg %p909_p12 }
  0x23   : > { %p915_p3 = pnand %p914_p2, %p910_p13 }
  0x2c   : > { %821 = vmatmul.msk.bf16.vlgmr.msrb.gmra.mxu1 %vm354_vm0, %v844_v7 }
  0x98   : > { %v367_v9 = vpop.f32.mrf.mxu0 }
  0x99   : > { %822 = vmatmul.msk.f32.vlgmr.msrb.gmra.mxu0 %vm461_vm1, %v367_v9  ;;  %v395_v10 = vpop.f32.mrf.mxu1 }
  0x9e   : > { %v423_v11 = vpop.f32.mrf.mxu2 }
  0x9f   : > { %826 = vmatmul.msk.f32.vlgmr.msra.gmra.mxu3 %vm461_vm1, %v423_v11 }
  0xa0   : > { %v369_v12 = vpop.f32.mrf.mxu0 }
  0xa1   : > { %823 = vmatmul.msk.f32.gmra.mxu0 %vm461_vm1, %v369_v12  ;;  %v397_v13 = vpop.f32.mrf.mxu1 }
  0xa6   : > { %v425_v14 = vpop.f32.mrf.mxu2 }
  0xa7   : > { %827 = vmatmul.msk.f32.gmra.mxu3 %vm461_vm1, %v425_v14 }
  0xa9   : > { %824 = vmatmul.msk.f32.gmra.mxu0 %vm461_vm1, %v395_v10  ;;  %v451_v15 = vpop.f32.mrf.mxu1 }
  0xaf   : > { %828 = vmatmul.msk.f32.gmra.mxu3 %vm461_vm1, %v451_v15 }
  0xb1   : > { %825 = vmatmul.msk.f32.gmra.mxu0 %vm461_vm1, %v397_v13  ;;  %v453_v16 = vpop.f32.mrf.mxu1 }
  0xb7   : > { %829 = vmatmul.msk.f32.gmra.mxu3 %vm461_vm1, %v453_v16 }
 0x116   : > { %v503_v17 = vpop.f32.mrf.mxu0 }
 0x117   : > { %v504_v20 = vadd.f32 %v889_v18, %v503_v17 }
 0x119   : > { %v527_v24 = vmax.f32 %v504_v20, 0.0 }
 0x11e   : > { %v506_v19 = vpop.f32.mrf.mxu0 }
 0x11f   : > { %v507_v21 = vadd.f32 %v889_v18, %v506_v19 }
 0x121   : > { %v528_v22 = vmax.f32 %v507_v21, 0.0 }
 0x122   : > { %v515_v23 = vpop.f32.mrf.mxu3 }
 0x123   : > { %556 = vmatpush.msra.mxu1 %v528_v22  ;;  %v516_v28 = vadd.f32 %v889_v18, %v515_v23 }
 0x125   : > { %557 = vmatpush.msra.mxu1 %v527_v24  ;;  %v531_v32 = vmax.f32 %v516_v28, 0.0 }
 0x126   : > { %v509_v26 = vpop.f32.mrf.mxu0  ;;  %830 = vmatmul.msk.f32.vlgmr.msra.gmra.mxu1 %vm354_vm0, %v535_v25 }
 0x127   : > { %v510_v33 = vadd.f32 %v889_v18, %v509_v26 }
 0x129   : > { %v529_v38 = vmax.f32 %v510_v33, 0.0 }
 0x12a   : > { %v518_v27 = vpop.f32.mrf.mxu3 }
 0x12b   : > { %v519_v29 = vadd.f32 %v889_v18, %v518_v27 }
 0x12d   : > { %v532_v30 = vmax.f32 %v519_v29, 0.0 }
 0x12e   : > { %v512_v31 = vpop.f32.mrf.mxu0 }
 0x12f   : > { %v513_v34 = vadd.f32 %v889_v18, %v512_v31  ;;  %602 = vmatpush.msrb.mxu3 %v532_v30 }
 0x131   : > { %v530_v36 = vmax.f32 %v513_v34, 0.0  ;;  %603 = vmatpush.msrb.mxu3 %v531_v32 }
 0x132   : > { %v521_v37 = vpop.f32.mrf.mxu3  ;;  %832 = vmatmul.msk.f32.vlgmr.msrb.gmra.mxu3 %vm354_vm0, %v537_v35 }
 0x133   : > { %579 = vmatpush.msrb.mxu2 %v530_v36  ;;  %v522_v41 = vadd.f32 %v889_v18, %v521_v37 }
 0x135   : > { %580 = vmatpush.msrb.mxu2 %v529_v38  ;;  %v533_v44 = vmax.f32 %v522_v41, 0.0 }
 0x136   : > { %831 = vmatmul.msk.f32.vlgmr.msrb.gmra.mxu2 %vm354_vm0, %v536_v39 }
 0x137   : > { %667 = vmatpush.msra.mxu2 %v634_v46 }
 0x139   : > { %668 = vmatpush.msra.mxu2 %v633_v47 }
 0x13a   : > { %v524_v40 = vpop.f32.mrf.mxu3 }
 0x13b   : > { %v525_v42 = vadd.f32 %v889_v18, %v524_v40  ;;  %669 = vmatpush.msra.mxu2 %v632_v48 }
 0x13d   : > { %v534_v43 = vmax.f32 %v525_v42, 0.0  ;;  %670 = vmatpush.msra.mxu2 %v631_v49 }
 0x13f   : > { %625 = vmatpush.msrb.mxu1 %v534_v43 }
 0x141   : > { %626 = vmatpush.msrb.mxu1 %v533_v44 }
 0x142   : > { %833 = vmatmul.msk.f32.vlgmr.msrb.gmra.mxu1 %vm354_vm0, %v538_v45 }
 0x1a3   : > { %v559_v50 = vpop.f32.mrf.mxu1 }
 0x1b5   : > { %v605_v53 = vpop.f32.mrf.mxu3 }
 0x1b6   : > { %v646_v54 = vrot.slane %v605_v53, 6 }
 0x1b9   : > { %v582_v51 = vpop.f32.mrf.mxu2 }
 0x1ba   : > { %v643_v52 = vrot.slane %v582_v51, 7 }
 0x1bc   : > { %v645_v55 = vsel %vm644_vm2, %v643_v52, %v559_v50 }
 0x1bd   : > { %v648_v58 = vsel %vm647_vm3, %v646_v54, %v645_v55 }
 0x1bf   : > { %v628_v56 = vpop.f32.mrf.mxu1 }
 0x1c0   : > { %v649_v57 = vrot.slane %v628_v56, 5 }
 0x1c2   : > { %v651_v59 = vsel %vm650_vm4, %v649_v57, %v648_v58 }
 0x1c3   : > { %834 = vmatmul.msk.f32.vlgmr.msra.gmra.mxu2 %vm652_vm5, %v651_v59 }
 0x246   : > { %v672_v61 = vpop.f32.mrf.mxu2 }
 0x247   : > { %v673_v62 = vadd.f32 %v890_v60, %v672_v61 }
 0x249   : > { %v675_v63 = vmax.f32 %v673_v62, 0.0 }
 0x24b   : > { %677 = vst.msk [vmem:[%s306_s16] sm:$0xf] %vm676_vm6, %v675_v63 }
 0x24c   : > { %918 = shalt.err (!%p915_p3)
}
 0x24d   : > { %850 = dma.vmem_to_hbm [thread:$0]  (%p1030_p5), %s692_s17, 64, %s694_s18, %s679_s19  }
 0x24e PF: > { %p856_p4 = scmp.ge.s32.totalorder %s953_s27, 2  ;;  %s705_s23 = sand.u32 1, %s941_s24  }
 0x24f   : > { %s706_s9 = scalar_lea.sflag [#allocation3], %s705_s23 }
 0x250   : > { %p853_p7 = pnand %p856_p4, %p1034_p6 }
 0x252   : > { %p854_p8 = pneg %p853_p7 }
 0x254   : > { %936 = dma.done.wait (%p854_p8), %s706_s9, 64  }
 0x255   : > { %938 = vsyncadd (%p854_p8), %s706_s9, 4294967232  ;;  %p17_p9 = scmp.ge.s32.totalorder %s1018_s30, 4   ;;  %s1142_s24 = smov %s945_s25 }
 0x256   : > { %s1143_s25 = smov %s949_s26  ;;  %s1144_s26 = smov %s1028_s10 }
 0x257   : > { %s1145_s27 = smov %s1018_s30  ;;  %19 = sbr.rel (!%p17_p9) target bundleno = 3 (0x3), region = 89 }
 0x25c   :  { %712 = vsyncpa [#allocation3], 1 }
 0x25d   :  { %714 = vsyncpa [#allocation3 + $0x1], 1 }

</bundles_post_ra>
